<compile_context>
chip_gen: v7x
topology: tpu7x:2x2x1
jax: 0.10.0
libtpu: 0.0.40
codegen_flags: <defaults>
</compile_context>

<pallas_src>
import math
import jax
import jax.numpy as jnp
from jax.experimental import pallas as pl
from jax.experimental.pallas import tpu as pltpu


HIDDEN = 256


def _round_up(x, m):
    return ((x + m - 1) // m) * m


def qnetwork_kernel(state_ref, action_ref,
                    w_in_s_ref, w_in_a_ref, b_in_ref,
                    w2_ref, b2_ref, w4_ref, b4_ref,
                    w_head_ref, b_head_ref,
                    q_ref):
    """One batch tile of the twin-Q MLP: 5 MXU pushes, all activations in VMEM.

    Layer 1 is fused across both branches ([.., 512] = [h1 | h2]); layer 2 is
    two separate 256x256 dots (block-diag would double FLOPs); the head is a
    single block-diagonal [512, 2] dot producing a lane-packed [TB, 2] result.
    """
    wdt = w_in_s_ref.dtype

    s = state_ref[...].astype(wdt)
    a = action_ref[...].astype(wdt)

    # Fused first layer (both branches), split-weight form avoids any concat
    # of the un-aligned [B, S] / [B, A] inputs.
    h12 = (jnp.dot(s, w_in_s_ref[...], preferred_element_type=jnp.float32)
           + jnp.dot(a, w_in_a_ref[...], preferred_element_type=jnp.float32)
           + b_in_ref[...])
    h12 = jnp.maximum(h12, 0.0)                          # relu, f32

    h1 = h12[:, :HIDDEN].astype(wdt)                     # lane-aligned slice
    h2 = h12[:, HIDDEN:].astype(wdt)

    # Per-branch second layer.
    h1 = jnp.maximum(
        jnp.dot(h1, w2_ref[...], preferred_element_type=jnp.float32)
        + b2_ref[...], 0.0)
    h2 = jnp.maximum(
        jnp.dot(h2, w4_ref[...], preferred_element_type=jnp.float32)
        + b4_ref[...], 0.0)

    # Fused block-diagonal head -> single lane-packed [TB, 2] store
    # (col 0 = q1, col 1 = q2).
    hcat = jnp.concatenate([h1, h2], axis=-1).astype(wdt)     # 256-aligned concat
    q_ref[...] = (jnp.dot(hcat, w_head_ref[...],
                          preferred_element_type=jnp.float32)
                  + b_head_ref[...]).astype(q_ref.dtype)


def qnetwork_forward(state, action, packed, *, block_batch=256):
    """Batch-tiled pallas_call; returns (q1, q2), each [B, 1] float32."""
    B, S = state.shape
    A = action.shape[1]

    tb = _round_up(min(block_batch, _round_up(B, 8)), 8)
    padded_b = _round_up(B, tb)
    if padded_b != B:
        state = jnp.pad(state, ((0, padded_b - B), (0, 0)))
        action = jnp.pad(action, ((0, padded_b - B), (0, 0)))

    grid = (padded_b // tb,)

    batch_map = lambda i: (i, 0)       # row-tiled operands
    pinned_map = lambda i: (0, 0)      # weights/biases stay VMEM-resident

    in_specs = [
        pl.BlockSpec((tb, S), batch_map),
        pl.BlockSpec((tb, A), batch_map),
        pl.BlockSpec(packed["w_in_s"].shape, pinned_map),
        pl.BlockSpec(packed["w_in_a"].shape, pinned_map),
        pl.BlockSpec(packed["b_in"].shape, pinned_map),
        pl.BlockSpec(packed["w2"].shape, pinned_map),
        pl.BlockSpec(packed["b2"].shape, pinned_map),
        pl.BlockSpec(packed["w4"].shape, pinned_map),
        pl.BlockSpec(packed["b4"].shape, pinned_map),
        pl.BlockSpec(packed["w_head"].shape, pinned_map),
        pl.BlockSpec(packed["b_head"].shape, pinned_map),
    ]
    out_specs = pl.BlockSpec((tb, 2), batch_map)

    q12 = pl.pallas_call(
        qnetwork_kernel,
        grid=grid,
        in_specs=in_specs,
        out_specs=out_specs,
        out_shape=jax.ShapeDtypeStruct((padded_b, 2), jnp.float32),
        compiler_params=pltpu.CompilerParams(
            dimension_semantics=("parallel",)),
    )(state, action,
      packed["w_in_s"], packed["w_in_a"], packed["b_in"],
      packed["w2"], packed["b2"], packed["w4"], packed["b4"],
      packed["w_head"], packed["b_head"])

    q12 = q12[:B]
    return q12[:, 0:1], q12[:, 1:2]


def init_params(key, state_dim, action_dim):
    """nn.Linear-style init, weights stored as [in_features, out_features]."""
    in_dim = state_dim + action_dim

    def linear(k, fan_in, fan_out):
        kw, kb = jax.random.split(k)
        bound = 1.0 / math.sqrt(fan_in)
        w = jax.random.uniform(kw, (fan_in, fan_out), jnp.float32, -bound, bound)
        b = jax.random.uniform(kb, (1, fan_out), jnp.float32, -bound, bound)
        return w, b

    keys = jax.random.split(key, 6)
    w1, b1 = linear(keys[0], in_dim, HIDDEN)
    w2, b2 = linear(keys[1], HIDDEN, HIDDEN)
    wq1, bq1 = linear(keys[2], HIDDEN, 1)
    w3, b3 = linear(keys[3], in_dim, HIDDEN)
    w4, b4 = linear(keys[4], HIDDEN, HIDDEN)
    wq2, bq2 = linear(keys[5], HIDDEN, 1)

    return dict(w1=w1, b1=b1, w2=w2, b2=b2, wq1=wq1, bq1=bq1,
                w3=w3, b3=b3, w4=w4, b4=b4, wq2=wq2, bq2=bq2)


def pack_params(params, state_dim, weight_dtype=jnp.float32):
    """Fuse/split raw per-layer params into the kernel's packed layout.

    - Layer 1 of both branches fused along the output axis -> [S+A, 512],
      then split by rows into the state part [S, 512] and action part [A, 512]
      so the kernel never needs the concatenated [B, S+A] input.
    - Heads fused into a block-diagonal [512, 2] weight + [1, 2] bias.
    Weights optionally stored in bf16 (f32 MXU accumulation); biases stay f32.
    """
    w_in = jnp.concatenate([params["w1"], params["w3"]], axis=1)   # [S+A, 512]
    w_in_s = w_in[:state_dim]                                       # [S, 512]
    w_in_a = w_in[state_dim:]                                       # [A, 512]
    b_in = jnp.concatenate([params["b1"], params["b3"]], axis=1)    # [1, 512]

    w_head = jnp.zeros((2 * HIDDEN, 2), jnp.float32)
    w_head = w_head.at[:HIDDEN, 0:1].set(params["wq1"])
    w_head = w_head.at[HIDDEN:, 1:2].set(params["wq2"])             # [512, 2]
    b_head = jnp.concatenate([params["bq1"], params["bq2"]], axis=1)  # [1, 2]

    return dict(
        w_in_s=w_in_s.astype(weight_dtype),
        w_in_a=w_in_a.astype(weight_dtype),
        b_in=b_in,                                   # biases kept f32
        w2=params["w2"].astype(weight_dtype),
        b2=params["b2"],
        w4=params["w4"].astype(weight_dtype),
        b4=params["b4"],
        w_head=w_head.astype(weight_dtype),
        b_head=b_head,
    )


def reference_forward(state, action, params):
    """Pure-JAX reference matching the PyTorch module exactly (f32)."""
    sa = jnp.concatenate([state, action], axis=1)
    h1 = jax.nn.relu(sa @ params["w1"] + params["b1"])
    h1 = jax.nn.relu(h1 @ params["w2"] + params["b2"])
    q1 = h1 @ params["wq1"] + params["bq1"]
    h2 = jax.nn.relu(sa @ params["w3"] + params["b3"])
    h2 = jax.nn.relu(h2 @ params["w4"] + params["b4"])
    q2 = h2 @ params["wq2"] + params["bq2"]
    return q1, q2


if __name__ == "__main__":
    state_dim, action_dim = 8, 4

    key = jax.random.PRNGKey(0)
    k_params, k_state, k_action = jax.random.split(key, 3)
    params = init_params(k_params, state_dim, action_dim)

    # --- Test 1: small batch, f32 weights, single grid step -----------------
    batch = 8
    state = jax.random.normal(k_state, (batch, state_dim), jnp.float32)
    action = jax.random.normal(k_action, (batch, action_dim), jnp.float32)

    packed_f32 = pack_params(params, state_dim, jnp.float32)
    q1, q2 = qnetwork_forward(state, action, packed_f32)
    q1 = jax.block_until_ready(q1)
    q2 = jax.block_until_ready(q2)

    r1, r2 = reference_forward(state, action, params)
    assert q1.shape == (batch, 1) and q2.shape == (batch, 1)
    assert jnp.allclose(q1, r1, atol=1e-4, rtol=1e-4)
    assert jnp.allclose(q2, r2, atol=1e-4, rtol=1e-4)

    # --- Test 2: batch not a tile multiple + multiple grid steps ------------
    k_s2, k_a2 = jax.random.split(jax.random.PRNGKey(1))
    state2 = jax.random.normal(k_s2, (37, state_dim), jnp.float32)
    action2 = jax.random.normal(k_a2, (37, action_dim), jnp.float32)
    q1b, q2b = qnetwork_forward(state2, action2, packed_f32, block_batch=16)
    q1b = jax.block_until_ready(q1b)
    r1b, r2b = reference_forward(state2, action2, params)
    assert q1b.shape == (37, 1) and q2b.shape == (37, 1)
    assert jnp.allclose(q1b, r1b, atol=1e-4, rtol=1e-4)
    assert jnp.allclose(q2b, r2b, atol=1e-4, rtol=1e-4)

    # --- Test 3: bf16 weight storage (f32 accumulation), loose tolerance ----
    packed_bf16 = pack_params(params, state_dim, jnp.bfloat16)
    q1c, q2c = qnetwork_forward(state, action, packed_bf16)
    q1c = jax.block_until_ready(q1c)
    assert jnp.allclose(q1c, r1, atol=1e-1, rtol=1e-1)
    assert jnp.allclose(q2c, r2, atol=1e-1, rtol=1e-1)

    print("KERNEL_OK")
</pallas_src>

<mosaic_0001>
module attributes {stable_mosaic.version = 11 : i64} {
  func.func @qnetwork_kernel(%arg0: i32, %arg1: memref<8x8xf32, #tpu.memory_space<vmem>>, %arg2: memref<8x4xf32, #tpu.memory_space<vmem>>, %arg3: memref<8x512xf32, #tpu.memory_space<vmem>>, %arg4: memref<4x512xf32, #tpu.memory_space<vmem>>, %arg5: memref<1x512xf32, #tpu.memory_space<vmem>>, %arg6: memref<256x256xf32, #tpu.memory_space<vmem>>, %arg7: memref<1x256xf32, #tpu.memory_space<vmem>>, %arg8: memref<256x256xf32, #tpu.memory_space<vmem>>, %arg9: memref<1x256xf32, #tpu.memory_space<vmem>>, %arg10: memref<512x2xf32, #tpu.memory_space<vmem>>, %arg11: memref<1x2xf32, #tpu.memory_space<vmem>>, %arg12: memref<8x2xf32, #tpu.memory_space<vmem>>) attributes {dimension_semantics = [#tpu.dimension_semantics<parallel>], iteration_bounds = array<i64: 1>, scalar_prefetch = 0 : i64, scratch_operands = 0 : i64, tpu.core_type = #tpu.core_type<tc>, window_params = [{transform_indices = @transform_0, window_bounds = array<i64: 8, 8>}, {transform_indices = @transform_1, window_bounds = array<i64: 8, 4>}, {pipeline_mode = #tpu.pipeline_mode<synchronous>, transform_indices = @transform_2, window_bounds = array<i64: 8, 512>}, {pipeline_mode = #tpu.pipeline_mode<synchronous>, transform_indices = @transform_3, window_bounds = array<i64: 4, 512>}, {pipeline_mode = #tpu.pipeline_mode<synchronous>, transform_indices = @transform_4, window_bounds = array<i64: 1, 512>}, {pipeline_mode = #tpu.pipeline_mode<synchronous>, transform_indices = @transform_5, window_bounds = array<i64: 256, 256>}, {pipeline_mode = #tpu.pipeline_mode<synchronous>, transform_indices = @transform_6, window_bounds = array<i64: 1, 256>}, {pipeline_mode = #tpu.pipeline_mode<synchronous>, transform_indices = @transform_7, window_bounds = array<i64: 256, 256>}, {pipeline_mode = #tpu.pipeline_mode<synchronous>, transform_indices = @transform_8, window_bounds = array<i64: 1, 256>}, {pipeline_mode = #tpu.pipeline_mode<synchronous>, transform_indices = @transform_9, window_bounds = array<i64: 512, 2>}, {pipeline_mode = #tpu.pipeline_mode<synchronous>, transform_indices = @transform_10, window_bounds = array<i64: 1, 2>}, {transform_indices = @transform_11, window_bounds = array<i64: 8, 2>}]} {
    %c0 = arith.constant 0 : index
    %c0_0 = arith.constant 0 : index
    %0 = vector.load %arg1[%c0, %c0_0] : memref<8x8xf32, #tpu.memory_space<vmem>>, vector<8x8xf32>
    %c0_1 = arith.constant 0 : index
    %c0_2 = arith.constant 0 : index
    %1 = vector.load %arg2[%c0_1, %c0_2] : memref<8x4xf32, #tpu.memory_space<vmem>>, vector<8x4xf32>
    %c0_3 = arith.constant 0 : index
    %c0_4 = arith.constant 0 : index
    %2 = vector.load %arg3[%c0_3, %c0_4] : memref<8x512xf32, #tpu.memory_space<vmem>>, vector<8x512xf32>
    %cst = arith.constant dense<0.000000e+00> : vector<8x512xf32>
    %3 = tpu.matmul %0, %2, %cst {dimension_numbers = #tpu.dot_dimension_numbers<[1], [0], [0], [1], [0, 0, 1, 1], [], []>} : vector<8x8xf32>, vector<8x512xf32>, vector<8x512xf32> -> vector<8x512xf32>
    %c0_5 = arith.constant 0 : index
    %c0_6 = arith.constant 0 : index
    %4 = vector.load %arg4[%c0_5, %c0_6] : memref<4x512xf32, #tpu.memory_space<vmem>>, vector<4x512xf32>
    %cst_7 = arith.constant dense<0.000000e+00> : vector<8x512xf32>
    %5 = tpu.matmul %1, %4, %cst_7 {dimension_numbers = #tpu.dot_dimension_numbers<[1], [0], [0], [1], [0, 0, 1, 1], [], []>} : vector<8x4xf32>, vector<4x512xf32>, vector<8x512xf32> -> vector<8x512xf32>
    %6 = arith.addf %3, %5 : vector<8x512xf32>
    %c0_8 = arith.constant 0 : index
    %c0_9 = arith.constant 0 : index
    %7 = vector.load %arg5[%c0_8, %c0_9] : memref<1x512xf32, #tpu.memory_space<vmem>>, vector<1x512xf32>
    %8 = vector.broadcast %7 : vector<1x512xf32> to vector<8x512xf32>
    %9 = arith.addf %6, %8 : vector<8x512xf32>
    %cst_10 = arith.constant 0.000000e+00 : f32
    %10 = vector.broadcast %cst_10 : f32 to vector<8x512xf32>
    %11 = arith.maximumf %9, %10 : vector<8x512xf32>
    %12 = vector.extract_strided_slice %11 {offsets = [0, 0], sizes = [8, 256], strides = [1, 1]} : vector<8x512xf32> to vector<8x256xf32>
    %13 = vector.extract_strided_slice %11 {offsets = [0, 256], sizes = [8, 256], strides = [1, 1]} : vector<8x512xf32> to vector<8x256xf32>
    %c0_11 = arith.constant 0 : index
    %c0_12 = arith.constant 0 : index
    %14 = vector.load %arg6[%c0_11, %c0_12] : memref<256x256xf32, #tpu.memory_space<vmem>>, vector<256x256xf32>
    %cst_13 = arith.constant dense<0.000000e+00> : vector<8x256xf32>
    %15 = tpu.matmul %12, %14, %cst_13 {dimension_numbers = #tpu.dot_dimension_numbers<[1], [0], [0], [1], [0, 0, 1, 1], [], []>} : vector<8x256xf32>, vector<256x256xf32>, vector<8x256xf32> -> vector<8x256xf32>
    %c0_14 = arith.constant 0 : index
    %c0_15 = arith.constant 0 : index
    %16 = vector.load %arg7[%c0_14, %c0_15] : memref<1x256xf32, #tpu.memory_space<vmem>>, vector<1x256xf32>
    %17 = vector.broadcast %16 : vector<1x256xf32> to vector<8x256xf32>
    %18 = arith.addf %15, %17 : vector<8x256xf32>
    %cst_16 = arith.constant 0.000000e+00 : f32
    %19 = vector.broadcast %cst_16 : f32 to vector<8x256xf32>
    %20 = arith.maximumf %18, %19 : vector<8x256xf32>
    %c0_17 = arith.constant 0 : index
    %c0_18 = arith.constant 0 : index
    %21 = vector.load %arg8[%c0_17, %c0_18] : memref<256x256xf32, #tpu.memory_space<vmem>>, vector<256x256xf32>
    %cst_19 = arith.constant dense<0.000000e+00> : vector<8x256xf32>
    %22 = tpu.matmul %13, %21, %cst_19 {dimension_numbers = #tpu.dot_dimension_numbers<[1], [0], [0], [1], [0, 0, 1, 1], [], []>} : vector<8x256xf32>, vector<256x256xf32>, vector<8x256xf32> -> vector<8x256xf32>
    %c0_20 = arith.constant 0 : index
    %c0_21 = arith.constant 0 : index
    %23 = vector.load %arg9[%c0_20, %c0_21] : memref<1x256xf32, #tpu.memory_space<vmem>>, vector<1x256xf32>
    %24 = vector.broadcast %23 : vector<1x256xf32> to vector<8x256xf32>
    %25 = arith.addf %22, %24 : vector<8x256xf32>
    %cst_22 = arith.constant 0.000000e+00 : f32
    %26 = vector.broadcast %cst_22 : f32 to vector<8x256xf32>
    %27 = arith.maximumf %25, %26 : vector<8x256xf32>
    %28 = tpu.concatenate %20, %27 in 1 : vector<8x256xf32>, vector<8x256xf32> -> vector<8x512xf32>
    %c0_23 = arith.constant 0 : index
    %c0_24 = arith.constant 0 : index
    %29 = vector.load %arg10[%c0_23, %c0_24] : memref<512x2xf32, #tpu.memory_space<vmem>>, vector<512x2xf32>
    %cst_25 = arith.constant dense<0.000000e+00> : vector<8x2xf32>
    %30 = tpu.matmul %28, %29, %cst_25 {dimension_numbers = #tpu.dot_dimension_numbers<[1], [0], [0], [1], [0, 0, 1, 1], [], []>} : vector<8x512xf32>, vector<512x2xf32>, vector<8x2xf32> -> vector<8x2xf32>
    %c0_26 = arith.constant 0 : index
    %c0_27 = arith.constant 0 : index
    %31 = vector.load %arg11[%c0_26, %c0_27] : memref<1x2xf32, #tpu.memory_space<vmem>>, vector<1x2xf32>
    %32 = vector.broadcast %31 : vector<1x2xf32> to vector<8x2xf32>
    %33 = arith.addf %30, %32 : vector<8x2xf32>
    %c0_28 = arith.constant 0 : index
    %c0_29 = arith.constant 0 : index
    %34 = vector.load %arg12[%c0_28, %c0_29] : memref<8x2xf32, #tpu.memory_space<vmem>>, vector<8x2xf32>
    tpu.vector_store %arg12[%c0_28, %c0_29], %33 {strides = array<i32>} : memref<8x2xf32, #tpu.memory_space<vmem>>, vector<8x2xf32>,
    return
  }
  func.func @transform_0(%arg0: i32) -> (i32, i32) {
    %c0_i32 = arith.constant 0 : i32
    %c0_i32_0 = arith.constant 0 : i32
    return %arg0, %c0_i32 : i32, i32
  }
  func.func @transform_1(%arg0: i32) -> (i32, i32) {
    %c0_i32 = arith.constant 0 : i32
    %c0_i32_0 = arith.constant 0 : i32
    return %arg0, %c0_i32 : i32, i32
  }
  func.func @transform_2(%arg0: i32) -> (i32, i32) {
    %c0_i32 = arith.constant 0 : i32
    %c0_i32_0 = arith.constant 0 : i32
    %c0_i32_1 = arith.constant 0 : i32
    return %c0_i32, %c0_i32_0 : i32, i32
  }
  func.func @transform_3(%arg0: i32) -> (i32, i32) {
    %c0_i32 = arith.constant 0 : i32
    %c0_i32_0 = arith.constant 0 : i32
    %c0_i32_1 = arith.constant 0 : i32
    return %c0_i32, %c0_i32_0 : i32, i32
  }
  func.func @transform_4(%arg0: i32) -> (i32, i32) {
    %c0_i32 = arith.constant 0 : i32
    %c0_i32_0 = arith.constant 0 : i32
    %c0_i32_1 = arith.constant 0 : i32
    return %c0_i32, %c0_i32_0 : i32, i32
  }
  func.func @transform_5(%arg0: i32) -> (i32, i32) {
    %c0_i32 = arith.constant 0 : i32
    %c0_i32_0 = arith.constant 0 : i32
    %c0_i32_1 = arith.constant 0 : i32
    return %c0_i32, %c0_i32_0 : i32, i32
  }
  func.func @transform_6(%arg0: i32) -> (i32, i32) {
    %c0_i32 = arith.constant 0 : i32
    %c0_i32_0 = arith.constant 0 : i32
    %c0_i32_1 = arith.constant 0 : i32
    return %c0_i32, %c0_i32_0 : i32, i32
  }
  func.func @transform_7(%arg0: i32) -> (i32, i32) {
    %c0_i32 = arith.constant 0 : i32
    %c0_i32_0 = arith.constant 0 : i32
    %c0_i32_1 = arith.constant 0 : i32
    return %c0_i32, %c0_i32_0 : i32, i32
  }
  func.func @transform_8(%arg0: i32) -> (i32, i32) {
    %c0_i32 = arith.constant 0 : i32
    %c0_i32_0 = arith.constant 0 : i32
    %c0_i32_1 = arith.constant 0 : i32
    return %c0_i32, %c0_i32_0 : i32, i32
  }
  func.func @transform_9(%arg0: i32) -> (i32, i32) {
    %c0_i32 = arith.constant 0 : i32
    %c0_i32_0 = arith.constant 0 : i32
    %c0_i32_1 = arith.constant 0 : i32
    return %c0_i32, %c0_i32_0 : i32, i32
  }
  func.func @transform_10(%arg0: i32) -> (i32, i32) {
    %c0_i32 = arith.constant 0 : i32
    %c0_i32_0 = arith.constant 0 : i32
    %c0_i32_1 = arith.constant 0 : i32
    return %c0_i32, %c0_i32_0 : i32, i32
  }
  func.func @transform_11(%arg0: i32) -> (i32, i32) {
    %c0_i32 = arith.constant 0 : i32
    %c0_i32_0 = arith.constant 0 : i32
    return %arg0, %c0_i32 : i32, i32
  }
}

</mosaic_0001>

<bundles_post_ra>
// kernel: tpu_custom_call.1
= control target key start
LH: loop header
LB: loop body
LE: loop exit
PB: predicated region body
PF: predicated region fallthrough
CT: control target
= control target key end

     0   :  { %16 = vsyncpa [#allocation3], 0  ;;  %s1869_s0 = inlined_call_operand.hbm [shape: f32[8,8], index: 0, kind: input, shape index: {}]   ;;  %s1870_s1 = inlined_call_operand.vmem [shape: f32[8,4], index: 1, kind: input, shape index: {}]   ;;  %s1871_s2 = inlined_call_operand.vmem [shape: f32[8,512], index: 2, kind: input, shape index: {}]   ;;  %s1872_s3 = inlined_call_operand.hbm [shape: f32[4,512], index: 3, kind: input, shape index: {}]   ;;  %s1873_s4 = inlined_call_operand.hbm [shape: f32[1,512], index: 4, kind: input, shape index: {}]   ;;  %s1874_s5 = inlined_call_operand.vmem [shape: f32[256,256], index: 5, kind: input, shape index: {}]   ;;  %s1875_s6 = inlined_call_operand.vmem [shape: f32[1,256], index: 6, kind: input, shape index: {}]   ;;  %s1876_s7 = inlined_call_operand.hbm [shape: f32[256,256], index: 7, kind: input, shape index: {}]   ;;  %s1877_s8 = inlined_call_operand.vmem [shape: f32[1,256], index: 8, kind: input, shape index: {}]   ;;  %s1878_s9 = inlined_call_operand.vmem [shape: f32[512,2], index: 9, kind: input, shape index: {}]   ;;  %s1879_s10 = inlined_call_operand.vmem [shape: f32[1,2], index: 10, kind: input, shape index: {}]   ;;  %s1880_s11 = inlined_call_operand.vmem [shape: f32[8,2], index: 11, kind: output, shape index: {}]  }
   0x1   :  { %17 = vsyncpa [#allocation5], 0 }
   0x2   :  { %18 = vsyncpa [#allocation8], 0  ;;  %s1326_s17 = smov [#allocation4]   ;;  %s1327_s19 = smov [#allocation2]  }
   0x3   :  { %s39_s18 = sshll.u32 %s1326_s17, 4  ;;  %s25_s20 = sshll.u32 %s1327_s19, 4  ;;  %s40_s18 = int_to_ptr.vmem [resolvable:$true] %s39_s18  ;;  %s26_s20 = int_to_ptr.vmem [resolvable:$true] %s25_s20 }
   0x4   :  { %s1232_s23 = scalar_lea.hbm %s1872_s3, 256 }
   0x5   :  { %p1233_p0 = scmp.ne.s32.totalorder %s1872_s3, %s1232_s23  ;;  %p1236_p1 = scmp.lt.u32.totalorder %s1232_s23, %s1872_s3 }
   0x7   :  { %p1238_p2 = pnand %p1236_p1, %p1233_p0 }
   0x9   :  { %1241 = shalt.err (!%p1238_p2)
}
   0xa   :  { %s1242_s28 = scalar_lea.vmem %s40_s18, 256  ;;  %p1247_p4 = scmp.lt.s32.totalorder %s40_s18, %s40_s18 }
   0xb   :  { %p1243_p3 = scmp.ne.s32.totalorder %s40_s18, %s1242_s28  ;;  %p1248_p5 = scmp.lt.s32.totalorder %s1242_s28, %s1242_s28 }
   0xd   :  { %p1249_p6 = por %p1248_p5, %p1247_p4 }
   0xf   :  { %p1250_p7 = pnand %p1249_p6, %p1243_p3 }
  0x11   :  { %1253 = shalt.err (!%p1250_p7)
}
  0x12   :  { %42 = dma.hbm_to_vmem [thread:$0]  %s1872_s3, 256, %s40_s18, [#allocation5]  }
  0x13   :  { %s1254_s14 = scalar_lea.hbm %s1869_s0, 128 }
  0x14   :  { %p1255_p8 = scmp.ne.s32.totalorder %s1869_s0, %s1254_s14  ;;  %p1258_p9 = scmp.lt.u32.totalorder %s1254_s14, %s1869_s0 }
  0x16   :  { %p1260_p10 = pnand %p1258_p9, %p1255_p8 }
  0x18   :  { %1263 = shalt.err (!%p1260_p10)
}
  0x19   :  { %s1264_s21 = scalar_lea.vmem %s26_s20, 128  ;;  %p1269_p12 = scmp.lt.s32.totalorder %s26_s20, %s26_s20 }
  0x1a   :  { %p1265_p11 = scmp.ne.s32.totalorder %s26_s20, %s1264_s21  ;;  %p1270_p13 = scmp.lt.s32.totalorder %s1264_s21, %s1264_s21 }
  0x1c   :  { %p1271_p0 = por %p1270_p13, %p1269_p12 }
  0x1e   :  { %p1272_p1 = pnand %p1271_p0, %p1265_p11 }
  0x20   :  { %1275 = shalt.err (!%p1272_p1)
}
  0x21   :  { %28 = dma.hbm_to_vmem [thread:$0]  %s1869_s0, 128, %s26_s20, [#allocation3]  }
  0x22   :  { %s1328_s22 = smov [#allocation6]   ;;  %s1329_s24 = smov [#allocation7]  }
  0x23   :  { %s49_s23 = sshll.u32 %s1328_s22, 4  ;;  %s62_s25 = sshll.u32 %s1329_s24, 4  ;;  %s50_s23 = int_to_ptr.vmem [resolvable:$true] %s49_s23  ;;  %s1417_s25 = int_to_ptr.vmem [resolvable:$true] %s62_s25 }
  0x24   :  { %s1276_s28 = scalar_lea.hbm %s1873_s4, 64 }
  0x25   :  { %p1277_p2 = scmp.ne.s32.totalorder %s1873_s4, %s1276_s28  ;;  %p1280_p3 = scmp.lt.u32.totalorder %s1276_s28, %s1873_s4 }
  0x27   :  { %p1282_p4 = pnand %p1280_p3, %p1277_p2 }
  0x29   :  { %1285 = shalt.err (!%p1282_p4)
}
  0x2a   :  { %s1286_s0 = scalar_lea.vmem %s50_s23, 64  ;;  %p1291_p6 = scmp.lt.s32.totalorder %s50_s23, %s50_s23 }
  0x2b   :  { %p1287_p5 = scmp.ne.s32.totalorder %s50_s23, %s1286_s0  ;;  %p1292_p7 = scmp.lt.s32.totalorder %s1286_s0, %s1286_s0 }
  0x2d   :  { %p1293_p8 = por %p1292_p7, %p1291_p6 }
  0x2f   :  { %p1294_p9 = pnand %p1293_p8, %p1287_p5 }
  0x31   :  { %1297 = shalt.err (!%p1294_p9)
}
  0x32   :  { %52 = dma.hbm_to_vmem [thread:$0]  %s1873_s4, 64, %s50_s23, [#allocation5]  }
  0x33   :  { %s1298_s17 = scalar_lea.hbm %s1876_s7, 8192 }
  0x34   :  { %p1299_p10 = scmp.ne.s32.totalorder %s1876_s7, %s1298_s17  ;;  %p1302_p11 = scmp.lt.u32.totalorder %s1298_s17, %s1876_s7 }
  0x36   :  { %p1304_p12 = pnand %p1302_p11, %p1299_p10 }
  0x38   :  { %1307 = shalt.err (!%p1304_p12)
}
  0x39   :  { %s1308_s22 = scalar_lea.vmem %s1417_s25, 8192  ;;  %p1313_p0 = scmp.lt.s32.totalorder %s1417_s25, %s1417_s25 }
  0x3a   :  { %p1309_p13 = scmp.ne.s32.totalorder %s1417_s25, %s1308_s22  ;;  %p1314_p1 = scmp.lt.s32.totalorder %s1308_s22, %s1308_s22 }
  0x3c   :  { %p1315_p2 = por %p1314_p1, %p1313_p0 }
  0x3e   :  { %p1316_p3 = pnand %p1315_p2, %p1309_p13 }
  0x40   :  { %1319 = shalt.err (!%p1316_p3)
}
  0x41   :  { %s1330_s4 = smov 256   ;;  %s1331_s23 = smov 16  }
  0x42   :  { %68 = dma.hbm_to_vmem [thread:$0]  %s1876_s7, 8192, %s1417_s25, [#allocation8], %s1330_s4, %s1330_s4, %s1331_s23  }
  0x43   :  { %1320 = dma.done.wait [#allocation3], 128  }
  0x44   :  { %1321 = vsyncadd [#allocation3], 4294967168 }
  0x45   :  { %1322 = dma.done.wait [#allocation5], 320  }
  0x46   :  { %1323 = vsyncadd [#allocation5], 4294966976 }
  0x47   :  { %1324 = dma.done.wait [#allocation8], 8192  }
  0x48   :  { %1325 = vsyncadd [#allocation8], 4294959104  ;;  %v1332_v0 = vmov 0.0   ;;  %v93_v1 = vld [vmem:[#allocation4] sm:$0xff]  ;;  %vm103_vm0 = vcmask 1043456   ;;  %v94_v2 = vld [vmem:[#allocation4 + $0x8] sm:$0xff] }
  0x49   :  { %176 = vmatprep.mubr.f32.mxu0 %v1332_v0  ;;  %247 = vmatprep.mubr.f32.mxu1 %v1332_v0  ;;  %v97_v3 = vcombine.high %v93_v1, %v93_v1  ;;  %v98_v4 = vcombine.high %v94_v2, %v94_v2  ;;  %v88_v5 = vld [vmem:[%s1870_s1] sm:$0xff]  ;;  %vm99_vm1 = vcmask 31744   ;;  %v90_v6 = vld [vmem:[%s1871_s2 + $0x8] sm:$0xff]  ;;  %v92_v7 = vld [vmem:[%s1871_s2 + $0x18] sm:$0xff]  ;;  %vm254_vm2 = vcmask 64512  }
  0x4a   :  { %v431_v8 = vld [vmem:[%s1874_s5 + $0x8] sm:$0xff]  ;;  %v433_v9 = vld [vmem:[%s1874_s5 + $0x18] sm:$0xff]  ;;  %v89_v12 = vld [vmem:[%s1871_s2] sm:$0xff]  ;;  %vm939_vm3 = vcmask 15360  }
  0x4b   :  { %948 = vmatprep.subr.msk.mxu0 %vm103_vm0, %v97_v3  ;;  %951 = vmatprep.subr.msk.mxu1 %vm103_vm0, %v98_v4  ;;  %v580_v10 = vld [vmem:[#allocation7 + $0x8] sm:$0xff]  ;;  %v582_v11 = vld [vmem:[#allocation7 + $0x18] sm:$0xff]  ;;  %v1027_v14 = vpack.c.bf16 %v433_v9, %v431_v8  ;;  %v579_v18 = vld [vmem:[#allocation7] sm:$0xff] }
  0x4c   :  { %949 = vmatpush1.msk.msra.mxu0 %vm103_vm0, %v93_v1  ;;  %952 = vmatpush1.msk.msra.mxu1 %vm103_vm0, %v94_v2  ;;  %v91_v13 = vld [vmem:[%s1871_s2 + $0x10] sm:$0xff]  ;;  %v1091_v15 = vpack.c.bf16 %v582_v11, %v580_v10  ;;  %v430_v16 = vld [vmem:[%s1874_s5] sm:$0xff]  ;;  %v435_v20 = vld [vmem:[%s1874_s5 + $0x28] sm:$0xff] }
  0x4d   :  { %950 = vmatmul.mubr.msk.f32.vlgmr.msra.gmra.mrb[0].mxu0 %vm99_vm1, %v88_v5  ;;  %953 = vmatmul.mubr.msk.f32.vlgmr.msra.gmra.mrb[0].mxu1 %vm99_vm1, %v88_v5  ;;  %v432_v17 = vld [vmem:[%s1874_s5 + $0x10] sm:$0xff]  ;;  %v437_v21 = vld [vmem:[%s1874_s5 + $0x38] sm:$0xff]  ;;  %v584_v22 = vld [vmem:[#allocation7 + $0x28] sm:$0xff] }
  0x4e   :  { %258 = vmatprep.subr.mxu0 %v90_v6  ;;  %329 = vmatprep.subr.mxu1 %v92_v7  ;;  %v581_v19 = vld [vmem:[#allocation7 + $0x10] sm:$0xff]  ;;  %v586_v23 = vld [vmem:[#allocation7 + $0x38] sm:$0xff]  ;;  %v87_v24 = vld [vmem:[#allocation2] sm:$0xff]  ;;  %v1029_v25 = vpack.c.bf16 %v432_v17, %v430_v16  ;;  %v1031_v29 = vpack.c.bf16 %v437_v21, %v435_v20 }
  0x4f   :  { %259 = vmatpush1.msra.mxu0 %v89_v12  ;;  %330 = vmatpush1.msra.mxu1 %v91_v13  ;;  %v1093_v26 = vpack.c.bf16 %v581_v19, %v579_v18  ;;  %v434_v27 = vld [vmem:[%s1874_s5 + $0x20] sm:$0xff]  ;;  %v436_v28 = vld [vmem:[%s1874_s5 + $0x30] sm:$0xff]  ;;  %v1095_v30 = vpack.c.bf16 %v586_v23, %v584_v22  ;;  %v439_v33 = vld [vmem:[%s1874_s5 + $0x48] sm:$0xff] }
  0x50   :  { %322 = vmatprep.mubr.f32.mxu0 %v1332_v0  ;;  %393 = vmatprep.mubr.f32.mxu1 %v1332_v0  ;;  %v583_v31 = vld [vmem:[#allocation7 + $0x20] sm:$0xff]  ;;  %v585_v32 = vld [vmem:[#allocation7 + $0x30] sm:$0xff]  ;;  %v588_v35 = vld [vmem:[#allocation7 + $0x48] sm:$0xff]  ;;  %v1033_v37 = vpack.c.bf16 %v436_v28, %v434_v27 }
  0x51   :  { %1028 = vmatprep.subr.bf16.mxu0 %v1027_v14  ;;  %1092 = vmatprep.subr.bf16.mxu1 %v1091_v15  ;;  %v441_v34 = vld [vmem:[%s1874_s5 + $0x58] sm:$0xff]  ;;  %v1097_v38 = vpack.c.bf16 %v585_v32, %v583_v31  ;;  %v438_v39 = vld [vmem:[%s1874_s5 + $0x40] sm:$0xff]  ;;  %v440_v40 = vld [vmem:[%s1874_s5 + $0x50] sm:$0xff] }
  0x52   :  { %v590_v36 = vld [vmem:[#allocation7 + $0x58] sm:$0xff]  ;;  %v1035_v41 = vpack.c.bf16 %v441_v34, %v439_v33  ;;  %v587_v43 = vld [vmem:[#allocation7 + $0x40] sm:$0xff]  ;;  %v589_v44 = vld [vmem:[#allocation7 + $0x50] sm:$0xff]  ;;  %v1037_v49 = vpack.c.bf16 %v440_v40, %v438_v39 }
  0x53   :  { %v1099_v42 = vpack.c.bf16 %v590_v36, %v588_v35  ;;  %v443_v45 = vld [vmem:[%s1874_s5 + $0x68] sm:$0xff]  ;;  %v445_v46 = vld [vmem:[%s1874_s5 + $0x78] sm:$0xff]  ;;  %v1101_v50 = vpack.c.bf16 %v589_v44, %v587_v43  ;;  %v442_v51 = vld [vmem:[%s1874_s5 + $0x60] sm:$0xff] }
  0x54   :  { %v592_v47 = vld [vmem:[#allocation7 + $0x68] sm:$0xff]  ;;  %v594_v48 = vld [vmem:[#allocation7 + $0x78] sm:$0xff]  ;;  %v1039_v53 = vpack.c.bf16 %v445_v46, %v443_v45  ;;  %v591_v55 = vld [vmem:[#allocation7 + $0x60] sm:$0xff] }
  0x55   :  { %954 = vmatmul.mubr.msk.f32.vlgmr.msra.gmra.mrb[0].mxu0 %vm254_vm2, %v87_v24  ;;  %955 = vmatmul.mubr.msk.f32.vlgmr.msra.gmra.mrb[0].mxu1 %vm254_vm2, %v87_v24  ;;  %v444_v52 = vld [vmem:[%s1874_s5 + $0x70] sm:$0xff]  ;;  %v1103_v54 = vpack.c.bf16 %v594_v48, %v592_v47  ;;  %v447_v57 = vld [vmem:[%s1874_s5 + $0x88] sm:$0xff]  ;;  %v449_v58 = vld [vmem:[%s1874_s5 + $0x98] sm:$0xff] }
  0x56   :  { %1030 = vmatpush1.bf16.msra.mxu0 %v1029_v25  ;;  %1094 = vmatpush1.bf16.msra.mxu1 %v1093_v26  ;;  %v593_v56 = vld [vmem:[#allocation7 + $0x70] sm:$0xff]  ;;  %v596_v59 = vld [vmem:[#allocation7 + $0x88] sm:$0xff]  ;;  %v598_v60 = vld [vmem:[#allocation7 + $0x98] sm:$0xff]  ;;  %v1041_v61 = vpack.c.bf16 %v444_v52, %v442_v51  ;;  %v1043_v1 = vpack.c.bf16 %v449_v58, %v447_v57 }
  0x57   :  { %1032 = vmatprep.subr.bf16.mxu0 %v1031_v29  ;;  %1096 = vmatprep.subr.bf16.mxu1 %v1095_v30  ;;  %v1105_v62 = vpack.c.bf16 %v593_v56, %v591_v55  ;;  %v446_v63 = vld [vmem:[%s1874_s5 + $0x80] sm:$0xff]  ;;  %v448_v0 = vld [vmem:[%s1874_s5 + $0x90] sm:$0xff]  ;;  %v1107_v2 = vpack.c.bf16 %v598_v60, %v596_v59  ;;  %v451_v5 = vld [vmem:[%s1874_s5 + $0xa8] sm:$0xff] }
  0x58   :  { %v595_v3 = vld [vmem:[#allocation7 + $0x80] sm:$0xff]  ;;  %v597_v4 = vld [vmem:[#allocation7 + $0x90] sm:$0xff]  ;;  %v600_v7 = vld [vmem:[#allocation7 + $0xa8] sm:$0xff]  ;;  %v1045_v9 = vpack.c.bf16 %v448_v0, %v446_v63 }
  0x59   :  { %v453_v6 = vld [vmem:[%s1874_s5 + $0xb8] sm:$0xff]  ;;  %v1109_v10 = vpack.c.bf16 %v597_v4, %v595_v3  ;;  %v450_v11 = vld [vmem:[%s1874_s5 + $0xa0] sm:$0xff]  ;;  %v452_v12 = vld [vmem:[%s1874_s5 + $0xb0] sm:$0xff] }
  0x5a   :  { %1034 = vmatpush1.bf16.msra.mxu0 %v1033_v37  ;;  %1098 = vmatpush1.bf16.msra.mxu1 %v1097_v38  ;;  %v602_v8 = vld [vmem:[#allocation7 + $0xb8] sm:$0xff]  ;;  %v1047_v13 = vpack.c.bf16 %v453_v6, %v451_v5  ;;  %v599_v15 = vld [vmem:[#allocation7 + $0xa0] sm:$0xff]  ;;  %v601_v16 = vld [vmem:[#allocation7 + $0xb0] sm:$0xff]  ;;  %v1049_v21 = vpack.c.bf16 %v452_v12, %v450_v11 }
  0x5b   :  { %1036 = vmatprep.subr.bf16.mxu0 %v1035_v41  ;;  %1100 = vmatprep.subr.bf16.mxu1 %v1099_v42  ;;  %v1111_v14 = vpack.c.bf16 %v602_v8, %v600_v7  ;;  %v455_v17 = vld [vmem:[%s1874_s5 + $0xc8] sm:$0xff]  ;;  %v457_v18 = vld [vmem:[%s1874_s5 + $0xd8] sm:$0xff]  ;;  %v1113_v22 = vpack.c.bf16 %v601_v16, %v599_v15  ;;  %v454_v23 = vld [vmem:[%s1874_s5 + $0xc0] sm:$0xff] }
  0x5c   :  { %v604_v19 = vld [vmem:[#allocation7 + $0xc8] sm:$0xff]  ;;  %v606_v20 = vld [vmem:[#allocation7 + $0xd8] sm:$0xff]  ;;  %v1051_v25 = vpack.c.bf16 %v457_v18, %v455_v17  ;;  %v603_v27 = vld [vmem:[#allocation7 + $0xc0] sm:$0xff] }
  0x5d   :  { %v456_v24 = vld [vmem:[%s1874_s5 + $0xd0] sm:$0xff]  ;;  %v1115_v26 = vpack.c.bf16 %v606_v20, %v604_v19  ;;  %v459_v29 = vld [vmem:[%s1874_s5 + $0xe8] sm:$0xff]  ;;  %v461_v30 = vld [vmem:[%s1874_s5 + $0xf8] sm:$0xff] }
  0x5e   :  { %1038 = vmatpush1.bf16.msra.mxu0 %v1037_v49  ;;  %1102 = vmatpush1.bf16.msra.mxu1 %v1101_v50  ;;  %v605_v28 = vld [vmem:[#allocation7 + $0xd0] sm:$0xff]  ;;  %v608_v31 = vld [vmem:[#allocation7 + $0xe8] sm:$0xff]  ;;  %v610_v32 = vld [vmem:[#allocation7 + $0xf8] sm:$0xff]  ;;  %v1053_v33 = vpack.c.bf16 %v456_v24, %v454_v23  ;;  %v1055_v37 = vpack.c.bf16 %v461_v30, %v459_v29 }
  0x5f   :  { %1040 = vmatprep.subr.bf16.mxu0 %v1039_v53  ;;  %1104 = vmatprep.subr.bf16.mxu1 %v1103_v54  ;;  %v1117_v34 = vpack.c.bf16 %v605_v28, %v603_v27  ;;  %v458_v35 = vld [vmem:[%s1874_s5 + $0xe0] sm:$0xff]  ;;  %v460_v36 = vld [vmem:[%s1874_s5 + $0xf0] sm:$0xff]  ;;  %v1119_v38 = vpack.c.bf16 %v610_v32, %v608_v31  ;;  %v463_v41 = vld [vmem:[%s1874_s5 + $0x108] sm:$0xff] }
  0x60   :  { %v607_v39 = vld [vmem:[#allocation7 + $0xe0] sm:$0xff]  ;;  %v609_v40 = vld [vmem:[#allocation7 + $0xf0] sm:$0xff]  ;;  %v612_v43 = vld [vmem:[#allocation7 + $0x108] sm:$0xff]  ;;  %v1057_v45 = vpack.c.bf16 %v460_v36, %v458_v35 }
  0x61   :  { %v465_v42 = vld [vmem:[%s1874_s5 + $0x118] sm:$0xff]  ;;  %v1121_v46 = vpack.c.bf16 %v609_v40, %v607_v39  ;;  %v462_v47 = vld [vmem:[%s1874_s5 + $0x100] sm:$0xff]  ;;  %v464_v48 = vld [vmem:[%s1874_s5 + $0x110] sm:$0xff] }
  0x62   :  { %1042 = vmatpush1.bf16.msra.mxu0 %v1041_v61  ;;  %1106 = vmatpush1.bf16.msra.mxu1 %v1105_v62  ;;  %v614_v44 = vld [vmem:[#allocation7 + $0x118] sm:$0xff]  ;;  %v1059_v49 = vpack.c.bf16 %v465_v42, %v463_v41  ;;  %v611_v51 = vld [vmem:[#allocation7 + $0x100] sm:$0xff]  ;;  %v613_v52 = vld [vmem:[#allocation7 + $0x110] sm:$0xff]  ;;  %v1061_v57 = vpack.c.bf16 %v464_v48, %v462_v47 }
  0x63   :  { %1044 = vmatprep.subr.bf16.mxu0 %v1043_v1  ;;  %1108 = vmatprep.subr.bf16.mxu1 %v1107_v2  ;;  %v1123_v50 = vpack.c.bf16 %v614_v44, %v612_v43  ;;  %v467_v53 = vld [vmem:[%s1874_s5 + $0x128] sm:$0xff]  ;;  %v469_v54 = vld [vmem:[%s1874_s5 + $0x138] sm:$0xff]  ;;  %v1125_v58 = vpack.c.bf16 %v613_v52, %v611_v51  ;;  %v466_v59 = vld [vmem:[%s1874_s5 + $0x120] sm:$0xff] }
  0x64   :  { %v616_v55 = vld [vmem:[#allocation7 + $0x128] sm:$0xff]  ;;  %v618_v56 = vld [vmem:[#allocation7 + $0x138] sm:$0xff]  ;;  %v1063_v61 = vpack.c.bf16 %v469_v54, %v467_v53  ;;  %v615_v63 = vld [vmem:[#allocation7 + $0x120] sm:$0xff] }
  0x65   :  { %v468_v60 = vld [vmem:[%s1874_s5 + $0x130] sm:$0xff]  ;;  %v1127_v62 = vpack.c.bf16 %v618_v56, %v616_v55  ;;  %v471_v1 = vld [vmem:[%s1874_s5 + $0x148] sm:$0xff]  ;;  %v473_v2 = vld [vmem:[%s1874_s5 + $0x158] sm:$0xff] }
  0x66   :  { %1046 = vmatpush1.bf16.msra.mxu0 %v1045_v9  ;;  %1110 = vmatpush1.bf16.msra.mxu1 %v1109_v10  ;;  %v617_v0 = vld [vmem:[#allocation7 + $0x130] sm:$0xff]  ;;  %v620_v3 = vld [vmem:[#allocation7 + $0x148] sm:$0xff]  ;;  %v622_v4 = vld [vmem:[#allocation7 + $0x158] sm:$0xff]  ;;  %v1065_v5 = vpack.c.bf16 %v468_v60, %v466_v59  ;;  %v1067_v9 = vpack.c.bf16 %v473_v2, %v471_v1 }
  0x67   :  { %1048 = vmatprep.subr.bf16.mxu0 %v1047_v13  ;;  %1112 = vmatprep.subr.bf16.mxu1 %v1111_v14  ;;  %v1129_v6 = vpack.c.bf16 %v617_v0, %v615_v63  ;;  %v470_v7 = vld [vmem:[%s1874_s5 + $0x140] sm:$0xff]  ;;  %v472_v8 = vld [vmem:[%s1874_s5 + $0x150] sm:$0xff]  ;;  %v1131_v10 = vpack.c.bf16 %v622_v4, %v620_v3  ;;  %v475_v13 = vld [vmem:[%s1874_s5 + $0x168] sm:$0xff] }
  0x68   :  { %v619_v11 = vld [vmem:[#allocation7 + $0x140] sm:$0xff]  ;;  %v621_v12 = vld [vmem:[#allocation7 + $0x150] sm:$0xff]  ;;  %v624_v15 = vld [vmem:[#allocation7 + $0x168] sm:$0xff]  ;;  %v1069_v17 = vpack.c.bf16 %v472_v8, %v470_v7 }
  0x69   :  { %v477_v14 = vld [vmem:[%s1874_s5 + $0x178] sm:$0xff]  ;;  %v1133_v18 = vpack.c.bf16 %v621_v12, %v619_v11  ;;  %v474_v19 = vld [vmem:[%s1874_s5 + $0x160] sm:$0xff]  ;;  %v476_v20 = vld [vmem:[%s1874_s5 + $0x170] sm:$0xff] }
  0x6a   :  { %1050 = vmatpush1.bf16.msra.mxu0 %v1049_v21  ;;  %1114 = vmatpush1.bf16.msra.mxu1 %v1113_v22  ;;  %v626_v16 = vld [vmem:[#allocation7 + $0x178] sm:$0xff]  ;;  %v1071_v21 = vpack.c.bf16 %v477_v14, %v475_v13  ;;  %v623_v23 = vld [vmem:[#allocation7 + $0x160] sm:$0xff]  ;;  %v625_v24 = vld [vmem:[#allocation7 + $0x170] sm:$0xff]  ;;  %v1073_v29 = vpack.c.bf16 %v476_v20, %v474_v19 }
  0x6b   :  { %1052 = vmatprep.subr.bf16.mxu0 %v1051_v25  ;;  %1116 = vmatprep.subr.bf16.mxu1 %v1115_v26  ;;  %v1135_v22 = vpack.c.bf16 %v626_v16, %v624_v15  ;;  %v479_v25 = vld [vmem:[%s1874_s5 + $0x188] sm:$0xff]  ;;  %v481_v26 = vld [vmem:[%s1874_s5 + $0x198] sm:$0xff]  ;;  %v1137_v30 = vpack.c.bf16 %v625_v24, %v623_v23  ;;  %v478_v31 = vld [vmem:[%s1874_s5 + $0x180] sm:$0xff] }
  0x6c   :  { %v628_v27 = vld [vmem:[#allocation7 + $0x188] sm:$0xff]  ;;  %v630_v28 = vld [vmem:[#allocation7 + $0x198] sm:$0xff]  ;;  %v627_v35 = vld [vmem:[#allocation7 + $0x180] sm:$0xff] }
  0x6d   :  { %v480_v32 = vld [vmem:[%s1874_s5 + $0x190] sm:$0xff]  ;;  %v632_v39 = vld [vmem:[#allocation7 + $0x1a8] sm:$0xff]  ;;  %v631_v47 = vld [vmem:[#allocation7 + $0x1a0] sm:$0xff] }
  0x6e   :  { %1054 = vmatpush1.bf16.msra.mxu0 %v1053_v33  ;;  %1118 = vmatpush1.bf16.msra.mxu1 %v1117_v34  ;;  %v1075_v33 = vpack.c.bf16 %v481_v26, %v479_v25  ;;  %v1139_v34 = vpack.c.bf16 %v630_v28, %v628_v27  ;;  %v629_v36 = vld [vmem:[#allocation7 + $0x190] sm:$0xff]  ;;  %v634_v40 = vld [vmem:[#allocation7 + $0x1b8] sm:$0xff]  ;;  %v1077_v41 = vpack.c.bf16 %v480_v32, %v478_v31  ;;  %v482_v43 = vld [vmem:[%s1874_s5 + $0x1a0] sm:$0xff] }
  0x6f   :  { %1056 = vmatprep.subr.bf16.mxu0 %v1055_v37  ;;  %1120 = vmatprep.subr.bf16.mxu1 %v1119_v38  ;;  %v483_v37 = vld [vmem:[%s1874_s5 + $0x1a8] sm:$0xff]  ;;  %v485_v38 = vld [vmem:[%s1874_s5 + $0x1b8] sm:$0xff]  ;;  %v1141_v42 = vpack.c.bf16 %v629_v36, %v627_v35  ;;  %v484_v44 = vld [vmem:[%s1874_s5 + $0x1b0] sm:$0xff] }
  0x70   :  { %v633_v48 = vld [vmem:[#allocation7 + $0x1b0] sm:$0xff]  ;;  %v636_v51 = vld [vmem:[#allocation7 + $0x1c8] sm:$0xff]  ;;  %v638_v52 = vld [vmem:[#allocation7 + $0x1d8] sm:$0xff]  ;;  %v1081_v53 = vpack.c.bf16 %v484_v44, %v482_v43 }
  0x71   :  { %v1145_v54 = vpack.c.bf16 %v633_v48, %v631_v47  ;;  %v1147_v56 = vpack.c.bf16 %v638_v52, %v636_v51  ;;  %v635_v59 = vld [vmem:[#allocation7 + $0x1c0] sm:$0xff]  ;;  %v491_v63 = vld [vmem:[%s1874_s5 + $0x1e8] sm:$0xff]  ;;  %v642_v3 = vld [vmem:[#allocation7 + $0x1f8] sm:$0xff] }
  0x72   :  { %1058 = vmatpush1.bf16.msra.mxu0 %v1057_v45  ;;  %1122 = vmatpush1.bf16.msra.mxu1 %v1121_v46  ;;  %v1079_v45 = vpack.c.bf16 %v485_v38, %v483_v37  ;;  %v1143_v46 = vpack.c.bf16 %v634_v40, %v632_v39  ;;  %v493_v0 = vld [vmem:[%s1874_s5 + $0x1f8] sm:$0xff]  ;;  %v640_v1 = vld [vmem:[#allocation7 + $0x1e8] sm:$0xff]  ;;  %v746_v38 = vld [vmem:[%s1878_s9 + $0x90] sm:$0xff] }
  0x73   :  { %1060 = vmatprep.subr.bf16.mxu0 %v1059_v49  ;;  %1124 = vmatprep.subr.bf16.mxu1 %v1123_v50  ;;  %v487_v49 = vld [vmem:[%s1874_s5 + $0x1c8] sm:$0xff]  ;;  %v489_v50 = vld [vmem:[%s1874_s5 + $0x1d8] sm:$0xff]  ;;  %v1087_v2 = vpack.c.bf16 %v493_v0, %v491_v63  ;;  %v490_v4 = vld [vmem:[%s1874_s5 + $0x1e0] sm:$0xff] }
  0x74   :  { %v1083_v55 = vpack.c.bf16 %v489_v50, %v487_v49  ;;  %v639_v8 = vld [vmem:[#allocation7 + $0x1e0] sm:$0xff]  ;;  %v745_v12 = vld [vmem:[%s1878_s9 + $0x88] sm:$0xff]  ;;  %v730_v48 = vld [vmem:[%s1878_s9 + $0x10] sm:$0xff] }
  0x75   :  { %v744_v11 = vld [vmem:[%s1878_s9 + $0x80] sm:$0xff]  ;;  %v777_v15 = vld [vmem:[%s1878_s9 + $0x188] sm:$0xff]  ;;  %v779_v43 = vld [vmem:[%s1878_s9 + $0x198] sm:$0xff] }
  0x76   :  { %1062 = vmatpush1.bf16.msra.mxu0 %v1061_v57  ;;  %1126 = vmatpush1.bf16.msra.mxu1 %v1125_v58  ;;  %v486_v57 = vld [vmem:[%s1874_s5 + $0x1c0] sm:$0xff]  ;;  %v488_v58 = vld [vmem:[%s1874_s5 + $0x1d0] sm:$0xff]  ;;  %v1155_v14 = vpack.c.bf16 %v745_v12, %v744_v11  ;;  %v729_v31 = vld [vmem:[%s1878_s9 + $0x8] sm:$0xff] }
  0x77   :  { %1064 = vmatprep.subr.bf16.mxu0 %v1063_v61  ;;  %1128 = vmatprep.subr.bf16.mxu1 %v1127_v62  ;;  %v1085_v60 = vpack.c.bf16 %v488_v58, %v486_v57  ;;  %v637_v61 = vld [vmem:[#allocation7 + $0x1d0] sm:$0xff]  ;;  %v776_v13 = vld [vmem:[%s1878_s9 + $0x180] sm:$0xff]  ;;  %v731_v49 = vld [vmem:[%s1878_s9 + $0x18] sm:$0xff] }
  0x78   :  { %v1149_v62 = vpack.c.bf16 %v637_v61, %v635_v59  ;;  %v1187_v16 = vpack.c.bf16 %v777_v15, %v776_v13  ;;  %v760_v36 = vld [vmem:[%s1878_s9 + $0x100] sm:$0xff]  ;;  %v761_v37 = vld [vmem:[%s1878_s9 + $0x108] sm:$0xff]  ;;  %v735_v11 = vld [vmem:[%s1878_s9 + $0x38] sm:$0xff] }
  0x79   :  { %v1189_v47 = vpack.c.bf16 %v761_v37, %v760_v36  ;;  %v749_v57 = vld [vmem:[%s1878_s9 + $0xa8] sm:$0xff]  ;;  %v780_v58 = vld [vmem:[%s1878_s9 + $0x1a0] sm:$0xff]  ;;  %v767_v15 = vld [vmem:[%s1878_s9 + $0x138] sm:$0xff] }
  0x7a   :  { %1066 = vmatpush1.bf16.msra.mxu0 %v1065_v5  ;;  %1130 = vmatpush1.bf16.msra.mxu1 %v1129_v6  ;;  %v492_v5 = vld [vmem:[%s1874_s5 + $0x1f0] sm:$0xff]  ;;  %v1151_v6 = vpack.c.bf16 %v642_v3, %v640_v1  ;;  %v781_v59 = vld [vmem:[%s1878_s9 + $0x1a8] sm:$0xff]  ;;  %v739_v37 = vld [vmem:[%s1878_s9 + $0x58] sm:$0xff] }
  0x7b   :  { %1068 = vmatprep.subr.bf16.mxu0 %v1067_v9  ;;  %1132 = vmatprep.subr.bf16.mxu1 %v1131_v10  ;;  %v1089_v7 = vpack.c.bf16 %v492_v5, %v490_v4  ;;  %v641_v9 = vld [vmem:[#allocation7 + $0x1f0] sm:$0xff]  ;;  %v1195_v1 = vpack.c.bf16 %v781_v59, %v780_v58  ;;  %v751_v5 = vld [vmem:[%s1878_s9 + $0xb8] sm:$0xff] }
  0x7c   :  { %v1153_v10 = vpack.c.bf16 %v641_v9, %v639_v8  ;;  %v733_v63 = vld [vmem:[%s1878_s9 + $0x28] sm:$0xff]  ;;  %v750_v4 = vld [vmem:[%s1878_s9 + $0xb0] sm:$0xff] }
  0x7d   :  { %v765_v3 = vld [vmem:[%s1878_s9 + $0x128] sm:$0xff]  ;;  %v1167_v12 = vpack.c.bf16 %v751_v5, %v750_v4  ;;  %v738_v36 = vld [vmem:[%s1878_s9 + $0x50] sm:$0xff]  ;;  %v494_v4 = vld [vmem:[%s1875_s6] sm:$0x3] }
  0x7e   :  { %1070 = vmatpush1.bf16.msra.mxu0 %v1069_v17  ;;  %1134 = vmatpush1.bf16.msra.mxu1 %v1133_v18  ;;  %v402_v17 = vlaneseq  ;;  %v790_v58 = vld [vmem:[%s1878_s9 + $0x1f0] sm:$0xff]  ;;  %v643_v5 = vld [vmem:[%s1877_s8] sm:$0x3] }
  0x7f   :  { %1072 = vmatprep.subr.bf16.mxu0 %v1071_v21  ;;  %1136 = vmatprep.subr.bf16.mxu1 %v1135_v22  ;;  %v400_v21 = vld [vmem:[#allocation6] sm:$0xf] }
  0x80   :  { %v403_v18 = vshrl.u32 %v402_v17, 7  ;;  %v753_v17 = vld [vmem:[%s1878_s9 + $0xc8] sm:$0xff] }
  0x82   :  { %1074 = vmatpush1.bf16.msra.mxu0 %v1073_v29  ;;  %1138 = vmatpush1.bf16.msra.mxu1 %v1137_v30  ;;  %v1667_v19 = vsub.s32 0, %v403_v18  ;;  %v412_v20 = vsub.s32 2, %v403_v18  ;;  %v1669_v22 = vsub.s32 1, %v403_v18  ;;  %v416_v23 = vsub.s32 3, %v403_v18  ;;  %v728_v30 = vld [vmem:[%s1878_s9] sm:$0xff] }
  0x83   :  { %1076 = vmatprep.subr.bf16.mxu0 %v1075_v33  ;;  %1140 = vmatprep.subr.bf16.mxu1 %v1139_v34  ;;  %v784_v18 = vld [vmem:[%s1878_s9 + $0x1c0] sm:$0xff] }
  0x84   :  { %v405_v24 = vrot.slane %v400_v21, %v1667_v19  ;;  %v413_v25 = vrot.slane %v400_v21, %v412_v20  ;;  %v409_v26 = vrot.slane %v400_v21, %v1669_v22  ;;  %v417_v27 = vrot.slane %v400_v21, %v416_v23  ;;  %v785_v20 = vld [vmem:[%s1878_s9 + $0x1c8] sm:$0xff] }
  0x86   :  { %1078 = vmatpush1.bf16.msra.mxu0 %v1077_v41  ;;  %1142 = vmatpush1.bf16.msra.mxu1 %v1141_v42  ;;  %v747_v41 = vld [vmem:[%s1878_s9 + $0x98] sm:$0xff]  ;;  %v778_v42 = vld [vmem:[%s1878_s9 + $0x190] sm:$0xff] }
  0x87   :  { %1080 = vmatprep.subr.bf16.mxu0 %v1079_v45  ;;  %1144 = vmatprep.subr.bf16.mxu1 %v1143_v46  ;;  %v1157_v46 = vpack.c.bf16 %v729_v31, %v728_v30  ;;  %v1159_v52 = vpack.c.bf16 %v747_v41, %v746_v38  ;;  %v754_v30 = vld [vmem:[%s1878_s9 + $0xd0] sm:$0xff]  ;;  %v755_v31 = vld [vmem:[%s1878_s9 + $0xd8] sm:$0xff] }
  0x88   :  { %v1175_v38 = vpack.c.bf16 %v755_v31, %v754_v30  ;;  %v771_v41 = vld [vmem:[%s1878_s9 + $0x158] sm:$0xff] }
  0x8a   :  { %1082 = vmatpush1.bf16.msra.mxu0 %v1081_v53  ;;  %1146 = vmatpush1.bf16.msra.mxu1 %v1145_v54  ;;  %v1191_v53 = vpack.c.bf16 %v779_v43, %v778_v42  ;;  %v762_v54 = vld [vmem:[%s1878_s9 + $0x110] sm:$0xff]  ;;  %v756_v42 = vld [vmem:[%s1878_s9 + $0xe0] sm:$0xff]  ;;  %v757_v43 = vld [vmem:[%s1878_s9 + $0xe8] sm:$0xff] }
  0x8b   :  { %1084 = vmatprep.subr.bf16.mxu0 %v1083_v55  ;;  %1148 = vmatprep.subr.bf16.mxu1 %v1147_v56  ;;  %v763_v55 = vld [vmem:[%s1878_s9 + $0x118] sm:$0xff]  ;;  %v748_v56 = vld [vmem:[%s1878_s9 + $0xa0] sm:$0xff] }
  0x8c   :  { %v1193_v61 = vpack.c.bf16 %v763_v55, %v762_v54  ;;  %v1163_v0 = vpack.c.bf16 %v749_v57, %v748_v56  ;;  %v773_v54 = vld [vmem:[%s1878_s9 + $0x168] sm:$0xff]  ;;  %v758_v56 = vld [vmem:[%s1878_s9 + $0xf0] sm:$0xff]  ;;  %v759_v57 = vld [vmem:[%s1878_s9 + $0xf8] sm:$0xff] }
  0x8d   :  { %v1183_v59 = vpack.c.bf16 %v759_v57, %v758_v56 }
  0x8e   :  { %1086 = vmatpush1.bf16.msra.mxu0 %v1085_v60  ;;  %1150 = vmatpush1.bf16.msra.mxu1 %v1149_v62  ;;  %v1161_v60 = vpack.c.bf16 %v731_v49, %v730_v48  ;;  %v732_v62 = vld [vmem:[%s1878_s9 + $0x20] sm:$0xff]  ;;  %v1179_v48 = vpack.c.bf16 %v757_v43, %v756_v42 }
  0x8f   :  { %1088 = vmatprep.subr.bf16.mxu0 %v1087_v2  ;;  %1152 = vmatprep.subr.bf16.mxu1 %v1151_v6  ;;  %v764_v2 = vld [vmem:[%s1878_s9 + $0x120] sm:$0xff]  ;;  %v782_v6 = vld [vmem:[%s1878_s9 + $0x1b0] sm:$0xff]  ;;  %v1165_v8 = vpack.c.bf16 %v733_v63, %v732_v62  ;;  %v743_v62 = vld [vmem:[%s1878_s9 + $0x78] sm:$0xff] }
  0x90   :  { %v1197_v9 = vpack.c.bf16 %v765_v3, %v764_v2  ;;  %v775_v2 = vld [vmem:[%s1878_s9 + $0x178] sm:$0xff] }
  0x92   :  { %1090 = vmatpush1.bf16.msra.mxu0 %v1089_v7  ;;  %1154 = vmatpush1.bf16.msra.mxu1 %v1153_v10  ;;  %v783_v7 = vld [vmem:[%s1878_s9 + $0x1b8] sm:$0xff]  ;;  %v734_v10 = vld [vmem:[%s1878_s9 + $0x30] sm:$0xff] }
  0x93   :  { %1156 = vmatprep.subr.bf16.mxu0 %v1155_v14  ;;  %1188 = vmatprep.subr.bf16.mxu1 %v1187_v16  ;;  %v1199_v13 = vpack.c.bf16 %v783_v7, %v782_v6  ;;  %v766_v14 = vld [vmem:[%s1878_s9 + $0x130] sm:$0xff]  ;;  %v752_v16 = vld [vmem:[%s1878_s9 + $0xc0] sm:$0xff]  ;;  %v1169_v21 = vpack.c.bf16 %v735_v11, %v734_v10  ;;  %v499_v6 = vrot.slane %v494_v4, %v1667_v19 }
  0x94   :  { %v1201_v23 = vpack.c.bf16 %v767_v15, %v766_v14  ;;  %v648_v7 = vrot.slane %v643_v5, %v1667_v19 }
 0x128   :  { %v324_v28 = vpop.f32.mrb[0].mxu0  ;;  %v395_v29 = vpop.f32.mrb[0].mxu1 }
 0x129   :  { %v422_v32 = vadd.f32 %v405_v24, %v324_v28  ;;  %v424_v33 = vadd.f32 %v413_v25, %v395_v29  ;;  %v326_v34 = vpop.f32.mrb[1].mxu0  ;;  %v397_v35 = vpop.f32.mrb[1].mxu1  ;;  %v736_v24 = vld [vmem:[%s1878_s9 + $0x40] sm:$0xff]  ;;  %v737_v25 = vld [vmem:[%s1878_s9 + $0x48] sm:$0xff] }
 0x12a   :  { %v423_v39 = vadd.f32 %v409_v26, %v326_v34  ;;  %v425_v40 = vadd.f32 %v417_v27, %v397_v35  ;;  %v1171_v26 = vpack.c.bf16 %v753_v17, %v752_v16  ;;  %v1203_v27 = vpack.c.bf16 %v785_v20, %v784_v18  ;;  %v768_v28 = vld [vmem:[%s1878_s9 + $0x140] sm:$0xff]  ;;  %v769_v29 = vld [vmem:[%s1878_s9 + $0x148] sm:$0xff] }
 0x12b   :  { %v426_v50 = vmax.f32 %v422_v32, 0.0  ;;  %v428_v51 = vmax.f32 %v424_v33, 0.0  ;;  %v786_v32 = vld [vmem:[%s1878_s9 + $0x1d0] sm:$0xff]  ;;  %v787_v33 = vld [vmem:[%s1878_s9 + $0x1d8] sm:$0xff]  ;;  %v1173_v34 = vpack.c.bf16 %v737_v25, %v736_v24  ;;  %v1205_v35 = vpack.c.bf16 %v769_v29, %v768_v28 }
 0x12c   :  { %v427_v44 = vmax.f32 %v423_v39, 0.0  ;;  %v429_v45 = vmax.f32 %v425_v40, 0.0  ;;  %v1207_v39 = vpack.c.bf16 %v787_v33, %v786_v32  ;;  %v770_v40 = vld [vmem:[%s1878_s9 + $0x150] sm:$0xff] }
 0x12e   :  { %570 = vmatprep.mubr.f32.mxu0 %v427_v44  ;;  %719 = vmatprep.mubr.f32.mxu1 %v429_v45  ;;  %v788_v44 = vld [vmem:[%s1878_s9 + $0x1e0] sm:$0xff]  ;;  %v789_v45 = vld [vmem:[%s1878_s9 + $0x1e8] sm:$0xff] }
 0x12f   :  { %571 = vmatmul.mubr.f32.vlgmr.msra.gmra.mrb[2].mxu0 %v426_v50  ;;  %720 = vmatmul.mubr.f32.vlgmr.msra.gmra.mrb[2].mxu1 %v428_v51  ;;  %v1211_v49 = vpack.c.bf16 %v789_v45, %v788_v44  ;;  %v740_v50 = vld [vmem:[%s1878_s9 + $0x60] sm:$0xff]  ;;  %v741_v51 = vld [vmem:[%s1878_s9 + $0x68] sm:$0xff] }
 0x130   :  { %1158 = vmatpush3.bf16.msra.mxu0 %v1157_v46  ;;  %1190 = vmatpush3.bf16.msra.mxu1 %v1189_v47  ;;  %v1177_v46 = vpack.c.bf16 %v739_v37, %v738_v36  ;;  %v1209_v47 = vpack.c.bf16 %v771_v41, %v770_v40 }
 0x131   :  { %1160 = vmatprep.subr.bf16.mxu0 %v1159_v52  ;;  %1192 = vmatprep.subr.bf16.mxu1 %v1191_v53  ;;  %v772_v52 = vld [vmem:[%s1878_s9 + $0x160] sm:$0xff]  ;;  %v1181_v53 = vpack.c.bf16 %v741_v51, %v740_v50 }
 0x132   :  { %v1213_v55 = vpack.c.bf16 %v773_v54, %v772_v52 }
 0x134   :  { %1162 = vmatpush3.bf16.msra.mxu0 %v1161_v60  ;;  %1194 = vmatpush3.bf16.msra.mxu1 %v1193_v61  ;;  %v791_v60 = vld [vmem:[%s1878_s9 + $0x1f8] sm:$0xff]  ;;  %v742_v61 = vld [vmem:[%s1878_s9 + $0x70] sm:$0xff] }
 0x135   :  { %1164 = vmatprep.subr.bf16.mxu0 %v1163_v0  ;;  %1196 = vmatprep.subr.bf16.mxu1 %v1195_v1  ;;  %v1215_v63 = vpack.c.bf16 %v791_v60, %v790_v58  ;;  %v1185_v0 = vpack.c.bf16 %v743_v62, %v742_v61  ;;  %v774_v1 = vld [vmem:[%s1878_s9 + $0x170] sm:$0xff] }
 0x136   :  { %v1217_v3 = vpack.c.bf16 %v775_v2, %v774_v1 }
 0x138   :  { %1166 = vmatpush3.bf16.msra.mxu0 %v1165_v8  ;;  %1198 = vmatpush3.bf16.msra.mxu1 %v1197_v9  ;;  %v503_v8 = vrot.slane %v494_v4, %v1669_v22  ;;  %v652_v9 = vrot.slane %v643_v5, %v1669_v22  ;;  %v956_v22 = vld [vmem:[%s1879_s10] ss:$0 sm:$0xff] }
 0x139   :  { %1168 = vmatprep.subr.bf16.mxu0 %v1167_v12  ;;  %1200 = vmatprep.subr.bf16.mxu1 %v1199_v13 }
 0x13c   :  { %1170 = vmatpush3.bf16.msra.mxu0 %v1169_v21  ;;  %1202 = vmatpush3.bf16.msra.mxu1 %v1201_v23 }
 0x13d   :  { %1172 = vmatprep.subr.bf16.mxu0 %v1171_v26  ;;  %1204 = vmatprep.subr.bf16.mxu1 %v1203_v27 }
 0x140   :  { %1174 = vmatpush3.bf16.msra.mxu0 %v1173_v34  ;;  %1206 = vmatpush3.bf16.msra.mxu1 %v1205_v35 }
 0x141   :  { %1176 = vmatprep.subr.bf16.mxu0 %v1175_v38  ;;  %1208 = vmatprep.subr.bf16.mxu1 %v1207_v39 }
 0x144   :  { %1178 = vmatpush3.bf16.msra.mxu0 %v1177_v46  ;;  %1210 = vmatpush3.bf16.msra.mxu1 %v1209_v47 }
 0x145   :  { %1180 = vmatprep.subr.bf16.mxu0 %v1179_v48  ;;  %1212 = vmatprep.subr.bf16.mxu1 %v1211_v49 }
 0x148   :  { %1182 = vmatpush3.bf16.msra.mxu0 %v1181_v53  ;;  %1214 = vmatpush3.bf16.msra.mxu1 %v1213_v55 }
 0x149   :  { %1184 = vmatprep.subr.bf16.mxu0 %v1183_v59  ;;  %1216 = vmatprep.subr.bf16.mxu1 %v1215_v63 }
 0x14c   :  { %1186 = vmatpush3.bf16.msra.mxu0 %v1185_v0  ;;  %1218 = vmatpush3.bf16.msra.mxu1 %v1217_v3 }
 0x202   :  { %v572_v10 = vpop.f32.mrb[2].mxu0  ;;  %v721_v11 = vpop.f32.mrb[2].mxu1 }
 0x203   :  { %v573_v12 = vadd.f32 %v572_v10, %v499_v6  ;;  %v722_v13 = vadd.f32 %v721_v11, %v648_v7  ;;  %v574_v14 = vpop.f32.mrb[3].mxu0  ;;  %v723_v15 = vpop.f32.mrb[3].mxu1 }
 0x204   :  { %v575_v16 = vadd.f32 %v574_v14, %v503_v8  ;;  %v724_v17 = vadd.f32 %v723_v15, %v652_v9 }
 0x205   :  { %v577_v21 = vmax.f32 %v573_v12, 0.0  ;;  %v726_v23 = vmax.f32 %v722_v13, 0.0 }
 0x206   :  { %v578_v18 = vmax.f32 %v575_v16, 0.0  ;;  %v727_v20 = vmax.f32 %v724_v17, 0.0 }
 0x208   :  { %863 = vmatprep.mubr.f32.mxu0 %v578_v18  ;;  %933 = vmatprep.mubr.f32.mxu1 %v727_v20 }
 0x209   :  { %864 = vmatmul.mubr.f32.vlgmr.msra.gmra.mrb[4].mxu0 %v577_v21  ;;  %934 = vmatmul.mubr.f32.vlgmr.msra.gmra.mrb[4].mxu1 %v726_v23 }
 0x2dc   :  { %v989_v19 = vpop.f32.mrb[4].mxu0  ;;  %v1024_v24 = vpop.f32.mrb[4].mxu1 }
 0x2dd   :  { %v990_v25 = vpop.f32.mrb[5].mxu0  ;;  %v1025_v26 = vpop.f32.mrb[5].mxu1 }
 0x2de   :  { %v991_v27 = vadd.f32 %v990_v25, %v989_v19  ;;  %v1026_v28 = vadd.f32 %v1025_v26, %v1024_v24 }
 0x2e0   :  { %v866_v29 = vadd.f32 %v991_v27, %v956_v22 }
 0x2e2   :  { %v936_v30 = vadd.f32 %v1026_v28, %v866_v29 }
 0x2e4   :  { %940 = vst.msk [vmem:[%s1880_s11] sm:$0xff] %vm939_vm3, %v936_v30 }
 0x2e5   :  { %945 = vsyncpa [#allocation3], 1 }
 0x2e6   :  { %946 = vsyncpa [#allocation5], 1 }
 0x2e7   :  { %947 = vsyncpa [#allocation8], 1 }

</bundles_post_ra>
